<compile_context>
chip_gen: v5e
topology: v5e:2x2
jax: 0.10.0
libtpu: 0.0.40
codegen_flags: <defaults>
</compile_context>

<pallas_src>
import functools

import jax
import jax.numpy as jnp
import numpy as np
from jax import lax
from jax.experimental import pallas as pl
from jax.experimental.pallas import tpu as pltpu

ND_CONST = 1e-6            # deterministic "parameter" for PixelNorm
_HALO = 8                  # sublane-aligned halo; only 3 rows strictly needed (1 dy + 2 box)
_LANE = 128
_INVALID_DEPTH = -100.0
_DIFF_THRESH = 10.0


def _round_up(x, m):
    return (x + m - 1) // m * m


def _neighbor(a, s, axis):
    """b[..., i, ...] = a[..., i + s, ...] (wrap-around; callers mask boundaries)."""
    size = a.shape[axis]
    return pltpu.roll(a, shift=(-s) % size, axis=axis)


def normdiff_kernel(x_top_ref, x_ref, x_bot_ref, nd_ref, diff_ref, mask_ref, *,
                    nd_const, h_true, w_true, tile_h):
    i = pl.program_id(1)
    th = tile_h
    halo = _HALO
    s_rows = th + 2 * halo
    w = x_ref.shape[-1]

    # ---- Assemble the (TH + 2*HALO, W) depth slab. Halo rows whose global row
    # index falls outside the real image are forced invalid, which reproduces
    # the reference's zero-padded boundary handling exactly.
    x_slab = jnp.concatenate([x_top_ref[0], x_ref[0], x_bot_ref[0]], axis=0)
    row_l = lax.broadcasted_iota(jnp.int32, (s_rows, w), 0)
    col = lax.broadcasted_iota(jnp.int32, (s_rows, w), 1)
    row_g = row_l + (i * th - halo)                      # global row index

    in_image = jnp.logical_and(row_g >= 0, row_g < h_true)
    valid = jnp.logical_and(x_slab != 0.0, in_image)
    depth = jnp.where(valid, x_slab, _INVALID_DEPTH)

    # ---- MinModDiff: minmod of forward/backward one-sided differences,
    # zero at the true image boundary.  Sign-compare form (no fx*bx product,
    # so no underflow divergence from the sign-based reference).
    fx = jnp.where(col < w_true - 1, _neighbor(depth, +1, 1) - depth, 0.0)
    bx = jnp.where(col > 0, depth - _neighbor(depth, -1, 1), 0.0)
    mx = jnp.minimum(jnp.abs(fx), jnp.abs(bx))
    dx = jnp.where(jnp.logical_and(fx > 0.0, bx > 0.0), mx,
                   jnp.where(jnp.logical_and(fx < 0.0, bx < 0.0), -mx, 0.0))

    fy = jnp.where(row_g < h_true - 1, _neighbor(depth, +1, 0) - depth, 0.0)
    by = jnp.where(row_g > 0, depth - _neighbor(depth, -1, 0), 0.0)
    my = jnp.minimum(jnp.abs(fy), jnp.abs(by))
    dy = jnp.where(jnp.logical_and(fy > 0.0, by > 0.0), my,
                   jnp.where(jnp.logical_and(fy < 0.0, by < 0.0), -my, 0.0))

    invd_x = jnp.abs(dx) > _DIFF_THRESH
    invd_y = jnp.abs(dy) > _DIFF_THRESH
    keep_x = jnp.logical_and(jnp.logical_not(invd_x), valid)
    keep_y = jnp.logical_and(jnp.logical_not(invd_y), valid)

    # ---- Store diff & mask for the central TH rows right away (short live
    # ranges, before the PixelNorm / box-filter stage).  Direct bool->int8
    # cast, no int32 intermediate.
    c = slice(halo, halo + th)
    diff_ref[0, 0] = jnp.where(keep_x[c], dx[c], 0.0)
    diff_ref[0, 1] = jnp.where(keep_y[c], dy[c], 0.0)
    not_valid = jnp.logical_not(valid)
    mask_ref[0, 0] = jnp.logical_or(invd_x, not_valid)[c].astype(jnp.int8)
    mask_ref[0, 1] = jnp.logical_or(invd_y, not_valid)[c].astype(jnp.int8)

    # ---- PixelNorm across the (dx, dy) channel pair (exact reciprocal; the
    # approx EUP path would not hold the 1e-5 tolerance).
    inv = pl.reciprocal(jnp.sqrt(dx * dx + dy * dy) + nd_const, approx=False)
    ndf_x = jnp.where(keep_x, dx * inv, 0.0)
    ndf_y = jnp.where(keep_y, dy * inv, 0.0)

    # ---- 5x5 zero-padded avg pool as a separable box filter on the XLU.
    # Lane (W) pass: wrap-around from pltpu.roll is masked via the column
    # index (padded columns already hold zeros).  Sublane (H) pass: the 8-row
    # halo >= 2 and out-of-image rows are zero, so no masking is needed for
    # the central rows we store.
    def box5_lane(t):
        s = t + jnp.where(col >= 1, _neighbor(t, -1, 1), 0.0)
        s = s + jnp.where(col >= 2, _neighbor(t, -2, 1), 0.0)
        s = s + jnp.where(col < w - 1, _neighbor(t, +1, 1), 0.0)
        return s + jnp.where(col < w - 2, _neighbor(t, +2, 1), 0.0)

    def box5_sublane(t):
        return (t + _neighbor(t, -1, 0) + _neighbor(t, +1, 0)
                  + _neighbor(t, -2, 0) + _neighbor(t, +2, 0))

    nd_ref[0, 0] = box5_sublane(box5_lane(ndf_x))[c] * (1.0 / 25.0)
    nd_ref[0, 1] = box5_sublane(box5_lane(ndf_y))[c] * (1.0 / 25.0)


def _vmem_budget_bytes():
    """Scoped-VMEM limit to request, derived from the chip's physical VMEM."""
    try:
        cap = int(pltpu.get_tpu_info().vmem_capacity_bytes)
    except Exception:
        cap = 64 * 1024 * 1024          # assume the smallest (v7x per-core) VMEM
    return min(cap * 3 // 4, 100 * 1024 * 1024)


def _per_step_vmem(th, w_pad):
    """Rough per-grid-step VMEM footprint (double-buffered I/O + live temps)."""
    s = th + 2 * _HALO
    io = 2 * (s * w_pad * 4                  # input tile + halo blocks
              + 2 * (2 * th * w_pad * 4)     # nd + diff f32 outputs
              + 2 * th * w_pad)              # int8 mask output
    tmp = 12 * s * w_pad * 4                 # live (S, W) f32 intermediates
    return io + tmp


def _choose_tile_h(H, tile_h, w_pad, budget):
    """Pick TH: full 8-rounded height if it fits, else minimize H padding with
    32-aligned tiles (int8 mask sublane tiling) under the VMEM budget."""
    h8 = _round_up(H, _HALO)
    if h8 <= tile_h and _per_step_vmem(h8, w_pad) <= budget:
        return h8
    n_tiles = max(2, -(-H // max(32, min(int(tile_h), H))))
    while True:
        th = max(32, _round_up(-(-H // n_tiles), 32))
        if th == 32 or _per_step_vmem(th, w_pad) <= budget:
            return th
        n_tiles += 1


def norm_diff(x, nd_const=ND_CONST, tile_h=256):
    """x: (N, 1, H, W) f32 -> (nd_final, diff_final, invalid_mask), each (N, 2, H, W)."""
    N, C, H, W = x.shape
    assert C == 1, "NormDiff expects a single-channel depth map"

    w_pad = _round_up(W, _LANE)
    vmem_limit = _vmem_budget_bytes()
    th = _choose_tile_h(H, tile_h, w_pad, int(vmem_limit * 0.85))
    h_pad = _round_up(H, th)
    n_tiles = h_pad // th
    n_blk8 = h_pad // _HALO

    x2 = x[:, 0]
    if (h_pad, w_pad) != (H, W):
        x2 = jnp.pad(x2, ((0, 0), (0, h_pad - H), (0, w_pad - W)))

    kernel = functools.partial(
        normdiff_kernel, nd_const=float(nd_const), h_true=H, w_true=W, tile_h=th)

    top_map = lambda n, i: (n, jnp.maximum(i * (th // _HALO) - 1, 0), 0)
    cur_map = lambda n, i: (n, i, 0)
    bot_map = lambda n, i: (n, jnp.minimum((i + 1) * (th // _HALO), n_blk8 - 1), 0)
    out_map = lambda n, i: (n, 0, i, 0)

    # Advisory cost estimate so XLA can overlap the pad/crop with the kernel.
    px = N * h_pad * w_pad
    cost = pl.CostEstimate(
        flops=int(px * 64),
        transcendentals=int(px * 2),
        bytes_accessed=int(px * (4 + 2 * 4 + 2 * 4 + 2 * 1)),
    )

    out_shapes = (
        jax.ShapeDtypeStruct((N, 2, h_pad, w_pad), jnp.float32),
        jax.ShapeDtypeStruct((N, 2, h_pad, w_pad), jnp.float32),
        jax.ShapeDtypeStruct((N, 2, h_pad, w_pad), jnp.int8),
    )
    nd_final, diff_final, mask = pl.pallas_call(
        kernel,
        out_shape=out_shapes,
        grid=(N, n_tiles),
        in_specs=[
            pl.BlockSpec((1, _HALO, w_pad), top_map),   # 8-row halo above the tile
            pl.BlockSpec((1, th, w_pad), cur_map),      # current row tile
            pl.BlockSpec((1, _HALO, w_pad), bot_map),   # 8-row halo below the tile
        ],
        out_specs=(
            pl.BlockSpec((1, 2, th, w_pad), out_map),
            pl.BlockSpec((1, 2, th, w_pad), out_map),
            pl.BlockSpec((1, 2, th, w_pad), out_map),
        ),
        compiler_params=pltpu.CompilerParams(
            dimension_semantics=("parallel", "parallel"),
            vmem_limit_bytes=int(vmem_limit),
        ),
        cost_estimate=cost,
    )(x2, x2, x2)

    nd_final = nd_final[:, :, :H, :W]
    diff_final = diff_final[:, :, :H, :W]
    mask = mask[:, :, :H, :W].astype(bool)
    return nd_final, diff_final, mask


def ref_norm_diff(x, nd_const=ND_CONST):
    """Pure-JAX reference mirroring the PyTorch forward."""
    d = x[:, 0]
    valid = d != 0.0
    depth = jnp.where(valid, d, -100.0)

    zcol = jnp.zeros(depth.shape[:-1] + (1,), depth.dtype)
    zrow = jnp.zeros(depth.shape[:-2] + (1, depth.shape[-1]), depth.dtype)
    dxi = depth[:, :, 1:] - depth[:, :, :-1]
    fx = jnp.concatenate([dxi, zcol], axis=2)
    bx = jnp.concatenate([zcol, dxi], axis=2)
    dx = 0.5 * (jnp.sign(fx) + jnp.sign(bx)) * jnp.minimum(jnp.abs(fx), jnp.abs(bx))
    dyi = depth[:, 1:, :] - depth[:, :-1, :]
    fy = jnp.concatenate([dyi, zrow], axis=1)
    by = jnp.concatenate([zrow, dyi], axis=1)
    dy = 0.5 * (jnp.sign(fy) + jnp.sign(by)) * jnp.minimum(jnp.abs(fy), jnp.abs(by))

    diff = jnp.stack([dx, dy], axis=1)                       # (N, 2, H, W)
    invd = jnp.abs(diff) > 10.0
    norm = jnp.sqrt(jnp.sum(diff * diff, axis=1, keepdims=True))
    nd = diff / (norm + nd_const)
    keep = jnp.logical_and(jnp.logical_not(invd), valid[:, None])
    nd_f = jnp.where(keep, nd, 0.0)
    diff_f = jnp.where(keep, diff, 0.0)
    nd_pool = lax.reduce_window(nd_f, 0.0, lax.add, (1, 1, 5, 5), (1, 1, 1, 1), "SAME") / 25.0
    mask = jnp.logical_or(invd, jnp.logical_not(valid)[:, None])
    return nd_pool, diff_f, mask


if __name__ == "__main__":
    key = jax.random.PRNGKey(0)

    def make_input(k, shape):
        k1, k2 = jax.random.split(k)
        v = jax.random.normal(k1, shape, dtype=jnp.float32)
        # Sprinkle exact zeros so the valid/invalid-depth branch is exercised.
        return jnp.where(jax.random.uniform(k2, shape) < 0.2, 0.0, v)

    k1, k2, k3 = jax.random.split(key, 3)
    cases = [
        (make_input(k1, (2, 1, 16, 16)), 256),   # single row tile, W padded to 128
        (make_input(k2, (1, 1, 40, 24)), 16),    # multi row-tile path with real halos + crop
        (make_input(k3, (1, 1, 24, 128)), 256),  # W == w_pad: exercises lane wrap masking
    ]
    for x, tile_h in cases:
        fn = jax.jit(functools.partial(norm_diff, tile_h=tile_h))
        nd_final, diff_final, mask = jax.block_until_ready(fn(x))
        rnd, rdiff, rmask = ref_norm_diff(x)
        np.testing.assert_allclose(np.asarray(nd_final), np.asarray(rnd), rtol=1e-5, atol=2e-5)
        np.testing.assert_allclose(np.asarray(diff_final), np.asarray(rdiff), rtol=1e-5, atol=1e-5)
        np.testing.assert_array_equal(np.asarray(mask), np.asarray(rmask))
    print("KERNEL_OK")
</pallas_src>

<mosaic_0001>
module attributes {stable_mosaic.version = 11 : i64} {
  func.func @normdiff_kernel(%arg0: i32, %arg1: i32, %arg2: memref<1x8x128xf32, #tpu.memory_space<vmem>>, %arg3: memref<1x16x128xf32, #tpu.memory_space<vmem>>, %arg4: memref<1x8x128xf32, #tpu.memory_space<vmem>>, %arg5: memref<1x2x16x128xf32, #tpu.memory_space<vmem>>, %arg6: memref<1x2x16x128xf32, #tpu.memory_space<vmem>>, %arg7: memref<1x2x16x128xi8, #tpu.memory_space<vmem>>) attributes {dimension_semantics = [#tpu.dimension_semantics<parallel>, #tpu.dimension_semantics<parallel>], iteration_bounds = array<i64: 2, 1>, scalar_prefetch = 0 : i64, scratch_operands = 0 : i64, tpu.core_type = #tpu.core_type<tc>, window_params = [{transform_indices = @transform_0, window_bounds = array<i64: 1, 8, 128>}, {transform_indices = @transform_1, window_bounds = array<i64: 1, 16, 128>}, {transform_indices = @transform_2, window_bounds = array<i64: 1, 8, 128>}, {transform_indices = @transform_3, window_bounds = array<i64: 1, 2, 16, 128>}, {transform_indices = @transform_4, window_bounds = array<i64: 1, 2, 16, 128>}, {transform_indices = @transform_5, window_bounds = array<i64: 1, 2, 16, 128>}]} {
    %c0 = arith.constant 0 : index
    %c0_0 = arith.constant 0 : index
    %c0_1 = arith.constant 0 : index
    %0 = vector.load %arg2[%c0, %c0_0, %c0_1] : memref<1x8x128xf32, #tpu.memory_space<vmem>>, vector<1x8x128xf32>
    %1 = vector.shape_cast %0 : vector<1x8x128xf32> to vector<8x128xf32>
    %c0_2 = arith.constant 0 : index
    %c0_3 = arith.constant 0 : index
    %c0_4 = arith.constant 0 : index
    %2 = vector.load %arg3[%c0_2, %c0_3, %c0_4] : memref<1x16x128xf32, #tpu.memory_space<vmem>>, vector<1x16x128xf32>
    %3 = vector.shape_cast %2 : vector<1x16x128xf32> to vector<16x128xf32>
    %c0_5 = arith.constant 0 : index
    %c0_6 = arith.constant 0 : index
    %c0_7 = arith.constant 0 : index
    %4 = vector.load %arg4[%c0_5, %c0_6, %c0_7] : memref<1x8x128xf32, #tpu.memory_space<vmem>>, vector<1x8x128xf32>
    %5 = vector.shape_cast %4 : vector<1x8x128xf32> to vector<8x128xf32>
    %6 = tpu.concatenate %1, %3, %5 in 0 : vector<8x128xf32>, vector<16x128xf32>, vector<8x128xf32> -> vector<32x128xf32>
    %7 = tpu.iota {dimensions = array<i32: 0>} : vector<32x128xi32>
    %8 = tpu.iota {dimensions = array<i32: 1>} : vector<32x128xi32>
    %c16_i32 = arith.constant 16 : i32
    %9 = arith.muli %arg1, %c16_i32 : i32
    %c8_i32 = arith.constant 8 : i32
    %10 = arith.subi %9, %c8_i32 : i32
    %11 = vector.broadcast %10 : i32 to vector<32x128xi32>
    %12 = arith.addi %7, %11 : vector<32x128xi32>
    %c0_i32 = arith.constant 0 : i32
    %13 = vector.broadcast %c0_i32 : i32 to vector<32x128xi32>
    %14 = arith.cmpi sge, %12, %13 : vector<32x128xi32>
    %c16_i32_8 = arith.constant 16 : i32
    %15 = vector.broadcast %c16_i32_8 : i32 to vector<32x128xi32>
    %16 = arith.cmpi slt, %12, %15 : vector<32x128xi32>
    %17 = arith.andi %14, %16 : vector<32x128xi1>
    %cst = arith.constant 0.000000e+00 : f32
    %18 = vector.broadcast %cst : f32 to vector<32x128xf32>
    %19 = arith.cmpf one, %6, %18 : vector<32x128xf32>
    %20 = arith.andi %19, %17 : vector<32x128xi1>
    %cst_9 = arith.constant -1.000000e+02 : f32
    %21 = vector.broadcast %cst_9 : f32 to vector<32x128xf32>
    %22 = arith.select %20, %6, %21 : vector<32x128xi1>, vector<32x128xf32>
    %c15_i32 = arith.constant 15 : i32
    %23 = vector.broadcast %c15_i32 : i32 to vector<32x128xi32>
    %24 = arith.cmpi slt, %8, %23 : vector<32x128xi32>
    %c127_i32 = arith.constant 127 : i32
    %25 = tpu.dynamic_rotate %22 by %c127_i32 dim 1 : vector<32x128xf32>, i32 -> vector<32x128xf32>
    %26 = arith.subf %25, %22 : vector<32x128xf32>
    %cst_10 = arith.constant 0.000000e+00 : f32
    %27 = vector.broadcast %cst_10 : f32 to vector<32x128xf32>
    %28 = arith.select %24, %26, %27 : vector<32x128xi1>, vector<32x128xf32>
    %c0_i32_11 = arith.constant 0 : i32
    %29 = vector.broadcast %c0_i32_11 : i32 to vector<32x128xi32>
    %30 = arith.cmpi sgt, %8, %29 : vector<32x128xi32>
    %c1_i32 = arith.constant 1 : i32
    %31 = tpu.dynamic_rotate %22 by %c1_i32 dim 1 : vector<32x128xf32>, i32 -> vector<32x128xf32>
    %32 = arith.subf %22, %31 : vector<32x128xf32>
    %cst_12 = arith.constant 0.000000e+00 : f32
    %33 = vector.broadcast %cst_12 : f32 to vector<32x128xf32>
    %34 = arith.select %30, %32, %33 : vector<32x128xi1>, vector<32x128xf32>
    %35 = math.absf %28 : vector<32x128xf32>
    %36 = math.absf %34 : vector<32x128xf32>
    %37 = arith.minimumf %35, %36 : vector<32x128xf32>
    %cst_13 = arith.constant 0.000000e+00 : f32
    %38 = vector.broadcast %cst_13 : f32 to vector<32x128xf32>
    %39 = arith.cmpf ogt, %28, %38 : vector<32x128xf32>
    %cst_14 = arith.constant 0.000000e+00 : f32
    %40 = vector.broadcast %cst_14 : f32 to vector<32x128xf32>
    %41 = arith.cmpf ogt, %34, %40 : vector<32x128xf32>
    %42 = arith.andi %39, %41 : vector<32x128xi1>
    %cst_15 = arith.constant 0.000000e+00 : f32
    %43 = vector.broadcast %cst_15 : f32 to vector<32x128xf32>
    %44 = arith.cmpf olt, %28, %43 : vector<32x128xf32>
    %cst_16 = arith.constant 0.000000e+00 : f32
    %45 = vector.broadcast %cst_16 : f32 to vector<32x128xf32>
    %46 = arith.cmpf olt, %34, %45 : vector<32x128xf32>
    %47 = arith.andi %44, %46 : vector<32x128xi1>
    %cst_17 = arith.constant 0.000000e+00 : f32
    %48 = vector.broadcast %cst_17 : f32 to vector<32x128xf32>
    %49 = arith.subf %48, %37 : vector<32x128xf32>
    %cst_18 = arith.constant 0.000000e+00 : f32
    %50 = vector.broadcast %cst_18 : f32 to vector<32x128xf32>
    %51 = arith.select %47, %49, %50 : vector<32x128xi1>, vector<32x128xf32>
    %52 = arith.select %42, %37, %51 : vector<32x128xi1>, vector<32x128xf32>
    %c15_i32_19 = arith.constant 15 : i32
    %53 = vector.broadcast %c15_i32_19 : i32 to vector<32x128xi32>
    %54 = arith.cmpi slt, %12, %53 : vector<32x128xi32>
    %c31_i32 = arith.constant 31 : i32
    %55 = tpu.dynamic_rotate %22 by %c31_i32 dim 0 : vector<32x128xf32>, i32 -> vector<32x128xf32>
    %56 = arith.subf %55, %22 : vector<32x128xf32>
    %cst_20 = arith.constant 0.000000e+00 : f32
    %57 = vector.broadcast %cst_20 : f32 to vector<32x128xf32>
    %58 = arith.select %54, %56, %57 : vector<32x128xi1>, vector<32x128xf32>
    %c0_i32_21 = arith.constant 0 : i32
    %59 = vector.broadcast %c0_i32_21 : i32 to vector<32x128xi32>
    %60 = arith.cmpi sgt, %12, %59 : vector<32x128xi32>
    %c1_i32_22 = arith.constant 1 : i32
    %61 = tpu.dynamic_rotate %22 by %c1_i32_22 dim 0 : vector<32x128xf32>, i32 -> vector<32x128xf32>
    %62 = arith.subf %22, %61 : vector<32x128xf32>
    %cst_23 = arith.constant 0.000000e+00 : f32
    %63 = vector.broadcast %cst_23 : f32 to vector<32x128xf32>
    %64 = arith.select %60, %62, %63 : vector<32x128xi1>, vector<32x128xf32>
    %65 = math.absf %58 : vector<32x128xf32>
    %66 = math.absf %64 : vector<32x128xf32>
    %67 = arith.minimumf %65, %66 : vector<32x128xf32>
    %cst_24 = arith.constant 0.000000e+00 : f32
    %68 = vector.broadcast %cst_24 : f32 to vector<32x128xf32>
    %69 = arith.cmpf ogt, %58, %68 : vector<32x128xf32>
    %cst_25 = arith.constant 0.000000e+00 : f32
    %70 = vector.broadcast %cst_25 : f32 to vector<32x128xf32>
    %71 = arith.cmpf ogt, %64, %70 : vector<32x128xf32>
    %72 = arith.andi %69, %71 : vector<32x128xi1>
    %cst_26 = arith.constant 0.000000e+00 : f32
    %73 = vector.broadcast %cst_26 : f32 to vector<32x128xf32>
    %74 = arith.cmpf olt, %58, %73 : vector<32x128xf32>
    %cst_27 = arith.constant 0.000000e+00 : f32
    %75 = vector.broadcast %cst_27 : f32 to vector<32x128xf32>
    %76 = arith.cmpf olt, %64, %75 : vector<32x128xf32>
    %77 = arith.andi %74, %76 : vector<32x128xi1>
    %cst_28 = arith.constant 0.000000e+00 : f32
    %78 = vector.broadcast %cst_28 : f32 to vector<32x128xf32>
    %79 = arith.subf %78, %67 : vector<32x128xf32>
    %cst_29 = arith.constant 0.000000e+00 : f32
    %80 = vector.broadcast %cst_29 : f32 to vector<32x128xf32>
    %81 = arith.select %77, %79, %80 : vector<32x128xi1>, vector<32x128xf32>
    %82 = arith.select %72, %67, %81 : vector<32x128xi1>, vector<32x128xf32>
    %83 = math.absf %52 : vector<32x128xf32>
    %cst_30 = arith.constant 1.000000e+01 : f32
    %84 = vector.broadcast %cst_30 : f32 to vector<32x128xf32>
    %85 = arith.cmpf ogt, %83, %84 : vector<32x128xf32>
    %86 = math.absf %82 : vector<32x128xf32>
    %cst_31 = arith.constant 1.000000e+01 : f32
    %87 = vector.broadcast %cst_31 : f32 to vector<32x128xf32>
    %88 = arith.cmpf ogt, %86, %87 : vector<32x128xf32>
    %cst_32 = arith.constant dense<true> : vector<32x128xi1>
    %89 = arith.xori %85, %cst_32 : vector<32x128xi1>
    %90 = arith.andi %89, %20 : vector<32x128xi1>
    %cst_33 = arith.constant dense<true> : vector<32x128xi1>
    %91 = arith.xori %88, %cst_33 : vector<32x128xi1>
    %92 = arith.andi %91, %20 : vector<32x128xi1>
    %93 = vector.extract_strided_slice %90 {offsets = [8, 0], sizes = [16, 128], strides = [1, 1]} : vector<32x128xi1> to vector<16x128xi1>
    %94 = vector.extract_strided_slice %52 {offsets = [8, 0], sizes = [16, 128], strides = [1, 1]} : vector<32x128xf32> to vector<16x128xf32>
    %cst_34 = arith.constant 0.000000e+00 : f32
    %95 = vector.broadcast %cst_34 : f32 to vector<16x128xf32>
    %96 = arith.select %93, %94, %95 : vector<16x128xi1>, vector<16x128xf32>
    %c0_35 = arith.constant 0 : index
    %c0_36 = arith.constant 0 : index
    %c0_37 = arith.constant 0 : index
    %c0_38 = arith.constant 0 : index
    %97 = vector.load %arg6[%c0_35, %c0_36, %c0_37, %c0_38] : memref<1x2x16x128xf32, #tpu.memory_space<vmem>>, vector<1x1x16x128xf32>
    %98 = vector.shape_cast %97 : vector<1x1x16x128xf32> to vector<16x128xf32>
    %99 = vector.shape_cast %96 : vector<16x128xf32> to vector<1x1x16x128xf32>
    tpu.vector_store %arg6[%c0_35, %c0_36, %c0_37, %c0_38], %99 {strides = array<i32>} : memref<1x2x16x128xf32, #tpu.memory_space<vmem>>, vector<1x1x16x128xf32>,
    %100 = vector.extract_strided_slice %92 {offsets = [8, 0], sizes = [16, 128], strides = [1, 1]} : vector<32x128xi1> to vector<16x128xi1>
    %101 = vector.extract_strided_slice %82 {offsets = [8, 0], sizes = [16, 128], strides = [1, 1]} : vector<32x128xf32> to vector<16x128xf32>
    %cst_39 = arith.constant 0.000000e+00 : f32
    %102 = vector.broadcast %cst_39 : f32 to vector<16x128xf32>
    %103 = arith.select %100, %101, %102 : vector<16x128xi1>, vector<16x128xf32>
    %c0_40 = arith.constant 0 : index
    %c1 = arith.constant 1 : index
    %c0_41 = arith.constant 0 : index
    %c0_42 = arith.constant 0 : index
    %104 = vector.load %arg6[%c0_40, %c1, %c0_41, %c0_42] : memref<1x2x16x128xf32, #tpu.memory_space<vmem>>, vector<1x1x16x128xf32>
    %105 = vector.shape_cast %104 : vector<1x1x16x128xf32> to vector<16x128xf32>
    %106 = vector.shape_cast %103 : vector<16x128xf32> to vector<1x1x16x128xf32>
    tpu.vector_store %arg6[%c0_40, %c1, %c0_41, %c0_42], %106 {strides = array<i32>} : memref<1x2x16x128xf32, #tpu.memory_space<vmem>>, vector<1x1x16x128xf32>,
    %cst_43 = arith.constant dense<true> : vector<32x128xi1>
    %107 = arith.xori %20, %cst_43 : vector<32x128xi1>
    %108 = arith.ori %85, %107 : vector<32x128xi1>
    %109 = vector.extract_strided_slice %108 {offsets = [8, 0], sizes = [16, 128], strides = [1, 1]} : vector<32x128xi1> to vector<16x128xi1>
    %110 = arith.extui %109 : vector<16x128xi1> to vector<16x128xi8>
    %c0_44 = arith.constant 0 : index
    %c0_45 = arith.constant 0 : index
    %c0_46 = arith.constant 0 : index
    %c0_47 = arith.constant 0 : index
    %111 = vector.load %arg7[%c0_44, %c0_45, %c0_46, %c0_47] : memref<1x2x16x128xi8, #tpu.memory_space<vmem>>, vector<1x1x16x128xi8>
    %112 = vector.shape_cast %111 : vector<1x1x16x128xi8> to vector<16x128xi8>
    %113 = vector.shape_cast %110 : vector<16x128xi8> to vector<1x1x16x128xi8>
    tpu.vector_store %arg7[%c0_44, %c0_45, %c0_46, %c0_47], %113 {strides = array<i32>} : memref<1x2x16x128xi8, #tpu.memory_space<vmem>>, vector<1x1x16x128xi8>,
    %114 = arith.ori %88, %107 : vector<32x128xi1>
    %115 = vector.extract_strided_slice %114 {offsets = [8, 0], sizes = [16, 128], strides = [1, 1]} : vector<32x128xi1> to vector<16x128xi1>
    %116 = arith.extui %115 : vector<16x128xi1> to vector<16x128xi8>
    %c0_48 = arith.constant 0 : index
    %c1_49 = arith.constant 1 : index
    %c0_50 = arith.constant 0 : index
    %c0_51 = arith.constant 0 : index
    %117 = vector.load %arg7[%c0_48, %c1_49, %c0_50, %c0_51] : memref<1x2x16x128xi8, #tpu.memory_space<vmem>>, vector<1x1x16x128xi8>
    %118 = vector.shape_cast %117 : vector<1x1x16x128xi8> to vector<16x128xi8>
    %119 = vector.shape_cast %116 : vector<16x128xi8> to vector<1x1x16x128xi8>
    tpu.vector_store %arg7[%c0_48, %c1_49, %c0_50, %c0_51], %119 {strides = array<i32>} : memref<1x2x16x128xi8, #tpu.memory_space<vmem>>, vector<1x1x16x128xi8>,
    %120 = arith.mulf %52, %52 : vector<32x128xf32>
    %121 = arith.mulf %82, %82 : vector<32x128xf32>
    %122 = arith.addf %120, %121 : vector<32x128xf32>
    %123 = math.sqrt %122 : vector<32x128xf32>
    %cst_52 = arith.constant 9.99999997E-7 : f32
    %124 = vector.broadcast %cst_52 : f32 to vector<32x128xf32>
    %125 = arith.addf %123, %124 : vector<32x128xf32>
    %126 = tpu.reciprocal %125 : vector<32x128xf32> -> vector<32x128xf32>
    %127 = arith.mulf %52, %126 : vector<32x128xf32>
    %cst_53 = arith.constant 0.000000e+00 : f32
    %128 = vector.broadcast %cst_53 : f32 to vector<32x128xf32>
    %129 = arith.select %90, %127, %128 : vector<32x128xi1>, vector<32x128xf32>
    %130 = arith.mulf %82, %126 : vector<32x128xf32>
    %cst_54 = arith.constant 0.000000e+00 : f32
    %131 = vector.broadcast %cst_54 : f32 to vector<32x128xf32>
    %132 = arith.select %92, %130, %131 : vector<32x128xi1>, vector<32x128xf32>
    %c1_i32_55 = arith.constant 1 : i32
    %133 = vector.broadcast %c1_i32_55 : i32 to vector<32x128xi32>
    %134 = arith.cmpi sge, %8, %133 : vector<32x128xi32>
    %c1_i32_56 = arith.constant 1 : i32
    %135 = tpu.dynamic_rotate %129 by %c1_i32_56 dim 1 : vector<32x128xf32>, i32 -> vector<32x128xf32>
    %cst_57 = arith.constant 0.000000e+00 : f32
    %136 = vector.broadcast %cst_57 : f32 to vector<32x128xf32>
    %137 = arith.select %134, %135, %136 : vector<32x128xi1>, vector<32x128xf32>
    %138 = arith.addf %129, %137 : vector<32x128xf32>
    %c2_i32 = arith.constant 2 : i32
    %139 = vector.broadcast %c2_i32 : i32 to vector<32x128xi32>
    %140 = arith.cmpi sge, %8, %139 : vector<32x128xi32>
    %c2_i32_58 = arith.constant 2 : i32
    %141 = tpu.dynamic_rotate %129 by %c2_i32_58 dim 1 : vector<32x128xf32>, i32 -> vector<32x128xf32>
    %cst_59 = arith.constant 0.000000e+00 : f32
    %142 = vector.broadcast %cst_59 : f32 to vector<32x128xf32>
    %143 = arith.select %140, %141, %142 : vector<32x128xi1>, vector<32x128xf32>
    %144 = arith.addf %138, %143 : vector<32x128xf32>
    %c127_i32_60 = arith.constant 127 : i32
    %145 = vector.broadcast %c127_i32_60 : i32 to vector<32x128xi32>
    %146 = arith.cmpi slt, %8, %145 : vector<32x128xi32>
    %c127_i32_61 = arith.constant 127 : i32
    %147 = tpu.dynamic_rotate %129 by %c127_i32_61 dim 1 : vector<32x128xf32>, i32 -> vector<32x128xf32>
    %cst_62 = arith.constant 0.000000e+00 : f32
    %148 = vector.broadcast %cst_62 : f32 to vector<32x128xf32>
    %149 = arith.select %146, %147, %148 : vector<32x128xi1>, vector<32x128xf32>
    %150 = arith.addf %144, %149 : vector<32x128xf32>
    %c126_i32 = arith.constant 126 : i32
    %151 = vector.broadcast %c126_i32 : i32 to vector<32x128xi32>
    %152 = arith.cmpi slt, %8, %151 : vector<32x128xi32>
    %c126_i32_63 = arith.constant 126 : i32
    %153 = tpu.dynamic_rotate %129 by %c126_i32_63 dim 1 : vector<32x128xf32>, i32 -> vector<32x128xf32>
    %cst_64 = arith.constant 0.000000e+00 : f32
    %154 = vector.broadcast %cst_64 : f32 to vector<32x128xf32>
    %155 = arith.select %152, %153, %154 : vector<32x128xi1>, vector<32x128xf32>
    %156 = arith.addf %150, %155 : vector<32x128xf32>
    %c1_i32_65 = arith.constant 1 : i32
    %157 = tpu.dynamic_rotate %156 by %c1_i32_65 dim 0 : vector<32x128xf32>, i32 -> vector<32x128xf32>
    %158 = arith.addf %156, %157 : vector<32x128xf32>
    %c31_i32_66 = arith.constant 31 : i32
    %159 = tpu.dynamic_rotate %156 by %c31_i32_66 dim 0 : vector<32x128xf32>, i32 -> vector<32x128xf32>
    %160 = arith.addf %158, %159 : vector<32x128xf32>
    %c2_i32_67 = arith.constant 2 : i32
    %161 = tpu.dynamic_rotate %156 by %c2_i32_67 dim 0 : vector<32x128xf32>, i32 -> vector<32x128xf32>
    %162 = arith.addf %160, %161 : vector<32x128xf32>
    %c30_i32 = arith.constant 30 : i32
    %163 = tpu.dynamic_rotate %156 by %c30_i32 dim 0 : vector<32x128xf32>, i32 -> vector<32x128xf32>
    %164 = arith.addf %162, %163 : vector<32x128xf32>
    %165 = vector.extract_strided_slice %164 {offsets = [8, 0], sizes = [16, 128], strides = [1, 1]} : vector<32x128xf32> to vector<16x128xf32>
    %cst_68 = arith.constant 4.000000e-02 : f32
    %166 = vector.broadcast %cst_68 : f32 to vector<16x128xf32>
    %167 = arith.mulf %165, %166 : vector<16x128xf32>
    %c0_69 = arith.constant 0 : index
    %c0_70 = arith.constant 0 : index
    %c0_71 = arith.constant 0 : index
    %c0_72 = arith.constant 0 : index
    %168 = vector.load %arg5[%c0_69, %c0_70, %c0_71, %c0_72] : memref<1x2x16x128xf32, #tpu.memory_space<vmem>>, vector<1x1x16x128xf32>
    %169 = vector.shape_cast %168 : vector<1x1x16x128xf32> to vector<16x128xf32>
    %170 = vector.shape_cast %167 : vector<16x128xf32> to vector<1x1x16x128xf32>
    tpu.vector_store %arg5[%c0_69, %c0_70, %c0_71, %c0_72], %170 {strides = array<i32>} : memref<1x2x16x128xf32, #tpu.memory_space<vmem>>, vector<1x1x16x128xf32>,
    %c1_i32_73 = arith.constant 1 : i32
    %171 = vector.broadcast %c1_i32_73 : i32 to vector<32x128xi32>
    %172 = arith.cmpi sge, %8, %171 : vector<32x128xi32>
    %c1_i32_74 = arith.constant 1 : i32
    %173 = tpu.dynamic_rotate %132 by %c1_i32_74 dim 1 : vector<32x128xf32>, i32 -> vector<32x128xf32>
    %cst_75 = arith.constant 0.000000e+00 : f32
    %174 = vector.broadcast %cst_75 : f32 to vector<32x128xf32>
    %175 = arith.select %172, %173, %174 : vector<32x128xi1>, vector<32x128xf32>
    %176 = arith.addf %132, %175 : vector<32x128xf32>
    %c2_i32_76 = arith.constant 2 : i32
    %177 = vector.broadcast %c2_i32_76 : i32 to vector<32x128xi32>
    %178 = arith.cmpi sge, %8, %177 : vector<32x128xi32>
    %c2_i32_77 = arith.constant 2 : i32
    %179 = tpu.dynamic_rotate %132 by %c2_i32_77 dim 1 : vector<32x128xf32>, i32 -> vector<32x128xf32>
    %cst_78 = arith.constant 0.000000e+00 : f32
    %180 = vector.broadcast %cst_78 : f32 to vector<32x128xf32>
    %181 = arith.select %178, %179, %180 : vector<32x128xi1>, vector<32x128xf32>
    %182 = arith.addf %176, %181 : vector<32x128xf32>
    %c127_i32_79 = arith.constant 127 : i32
    %183 = vector.broadcast %c127_i32_79 : i32 to vector<32x128xi32>
    %184 = arith.cmpi slt, %8, %183 : vector<32x128xi32>
    %c127_i32_80 = arith.constant 127 : i32
    %185 = tpu.dynamic_rotate %132 by %c127_i32_80 dim 1 : vector<32x128xf32>, i32 -> vector<32x128xf32>
    %cst_81 = arith.constant 0.000000e+00 : f32
    %186 = vector.broadcast %cst_81 : f32 to vector<32x128xf32>
    %187 = arith.select %184, %185, %186 : vector<32x128xi1>, vector<32x128xf32>
    %188 = arith.addf %182, %187 : vector<32x128xf32>
    %c126_i32_82 = arith.constant 126 : i32
    %189 = vector.broadcast %c126_i32_82 : i32 to vector<32x128xi32>
    %190 = arith.cmpi slt, %8, %189 : vector<32x128xi32>
    %c126_i32_83 = arith.constant 126 : i32
    %191 = tpu.dynamic_rotate %132 by %c126_i32_83 dim 1 : vector<32x128xf32>, i32 -> vector<32x128xf32>
    %cst_84 = arith.constant 0.000000e+00 : f32
    %192 = vector.broadcast %cst_84 : f32 to vector<32x128xf32>
    %193 = arith.select %190, %191, %192 : vector<32x128xi1>, vector<32x128xf32>
    %194 = arith.addf %188, %193 : vector<32x128xf32>
    %c1_i32_85 = arith.constant 1 : i32
    %195 = tpu.dynamic_rotate %194 by %c1_i32_85 dim 0 : vector<32x128xf32>, i32 -> vector<32x128xf32>
    %196 = arith.addf %194, %195 : vector<32x128xf32>
    %c31_i32_86 = arith.constant 31 : i32
    %197 = tpu.dynamic_rotate %194 by %c31_i32_86 dim 0 : vector<32x128xf32>, i32 -> vector<32x128xf32>
    %198 = arith.addf %196, %197 : vector<32x128xf32>
    %c2_i32_87 = arith.constant 2 : i32
    %199 = tpu.dynamic_rotate %194 by %c2_i32_87 dim 0 : vector<32x128xf32>, i32 -> vector<32x128xf32>
    %200 = arith.addf %198, %199 : vector<32x128xf32>
    %c30_i32_88 = arith.constant 30 : i32
    %201 = tpu.dynamic_rotate %194 by %c30_i32_88 dim 0 : vector<32x128xf32>, i32 -> vector<32x128xf32>
    %202 = arith.addf %200, %201 : vector<32x128xf32>
    %203 = vector.extract_strided_slice %202 {offsets = [8, 0], sizes = [16, 128], strides = [1, 1]} : vector<32x128xf32> to vector<16x128xf32>
    %cst_89 = arith.constant 4.000000e-02 : f32
    %204 = vector.broadcast %cst_89 : f32 to vector<16x128xf32>
    %205 = arith.mulf %203, %204 : vector<16x128xf32>
    %c0_90 = arith.constant 0 : index
    %c1_91 = arith.constant 1 : index
    %c0_92 = arith.constant 0 : index
    %c0_93 = arith.constant 0 : index
    %206 = vector.load %arg5[%c0_90, %c1_91, %c0_92, %c0_93] : memref<1x2x16x128xf32, #tpu.memory_space<vmem>>, vector<1x1x16x128xf32>
    %207 = vector.shape_cast %206 : vector<1x1x16x128xf32> to vector<16x128xf32>
    %208 = vector.shape_cast %205 : vector<16x128xf32> to vector<1x1x16x128xf32>
    tpu.vector_store %arg5[%c0_90, %c1_91, %c0_92, %c0_93], %208 {strides = array<i32>} : memref<1x2x16x128xf32, #tpu.memory_space<vmem>>, vector<1x1x16x128xf32>,
    return
  }
  func.func @transform_0(%arg0: i32, %arg1: i32) -> (i32, i32, i32) {
    %c2_i32 = arith.constant 2 : i32
    %0 = arith.muli %arg1, %c2_i32 : i32
    %c1_i32 = arith.constant 1 : i32
    %1 = arith.subi %0, %c1_i32 : i32
    %c0_i32 = arith.constant 0 : i32
    %2 = arith.maxsi %1, %c0_i32 : i32
    %c0_i32_0 = arith.constant 0 : i32
    %c0_i32_1 = arith.constant 0 : i32
    return %arg0, %2, %c0_i32_0 : i32, i32, i32
  }
  func.func @transform_1(%arg0: i32, %arg1: i32) -> (i32, i32, i32) {
    %c0_i32 = arith.constant 0 : i32
    %c0_i32_0 = arith.constant 0 : i32
    return %arg0, %arg1, %c0_i32 : i32, i32, i32
  }
  func.func @transform_2(%arg0: i32, %arg1: i32) -> (i32, i32, i32) {
    %c1_i32 = arith.constant 1 : i32
    %0 = arith.addi %arg1, %c1_i32 : i32
    %c2_i32 = arith.constant 2 : i32
    %1 = arith.muli %0, %c2_i32 : i32
    %c1_i32_0 = arith.constant 1 : i32
    %2 = arith.minsi %1, %c1_i32_0 : i32
    %c0_i32 = arith.constant 0 : i32
    %c0_i32_1 = arith.constant 0 : i32
    return %arg0, %2, %c0_i32 : i32, i32, i32
  }
  func.func @transform_3(%arg0: i32, %arg1: i32) -> (i32, i32, i32, i32) {
    %c0_i32 = arith.constant 0 : i32
    %c0_i32_0 = arith.constant 0 : i32
    %c0_i32_1 = arith.constant 0 : i32
    return %arg0, %c0_i32, %arg1, %c0_i32_0 : i32, i32, i32, i32
  }
  func.func @transform_4(%arg0: i32, %arg1: i32) -> (i32, i32, i32, i32) {
    %c0_i32 = arith.constant 0 : i32
    %c0_i32_0 = arith.constant 0 : i32
    %c0_i32_1 = arith.constant 0 : i32
    return %arg0, %c0_i32, %arg1, %c0_i32_0 : i32, i32, i32, i32
  }
  func.func @transform_5(%arg0: i32, %arg1: i32) -> (i32, i32, i32, i32) {
    %c0_i32 = arith.constant 0 : i32
    %c0_i32_0 = arith.constant 0 : i32
    %c0_i32_1 = arith.constant 0 : i32
    return %arg0, %c0_i32, %arg1, %c0_i32_0 : i32, i32, i32, i32
  }
}

</mosaic_0001>

<bundles_post_ra>
// kernel: norm_diff.1
= control target key start
LH: loop header
LB: loop body
LE: loop exit
PB: predicated region body
PF: predicated region fallthrough
CT: control target
= control target key end

     0   :  { %11 = vsyncpa [#allocation3], 0  ;;  %s2178_s0 = inlined_call_operand.vmem [shape: f32[2,16,128], index: 0, kind: input, shape index: {}, may-alias: {0,1,2}]   ;;  %s2179_s1 = inlined_call_operand.vmem [shape: f32[2,16,128], index: 1, kind: input, shape index: {}, may-alias: {0,1,2}]   ;;  %s2180_s2 = inlined_call_operand.vmem [shape: f32[2,16,128], index: 2, kind: input, shape index: {}, may-alias: {0,1,2}]   ;;  %s2181_s3 = inlined_call_operand.hbm [shape: f32[2,2,16,128], index: 3, kind: output, shape index: {0}]   ;;  %s2182_s4 = inlined_call_operand.hbm [shape: f32[2,2,16,128], index: 4, kind: output, shape index: {1}]   ;;  %s2183_s5 = inlined_call_operand.vmem [shape: s8[2,2,16,128], index: 5, kind: output, shape index: {2}]  }
   0x1   :  { %13 = vsyncpa [#allocation3 + $0x1], 0 }
   0x2   :  { %14 = vsyncpa [#allocation5], 0 }
   0x3   :  { %16 = vsyncpa [#allocation5 + $0x1], 0  ;;  %s1589_s0 = smov 0   ;;  %s1591_s18 = smov 0  }
   0x4   :  { %s1593_s19 = smov 0   ;;  %s1595_s2 = smov 0  }
   0x5   :  { %s1597_s20 = smov 0   ;;  %s1599_s21 = smov 0  }
   0x6 LB: > { %s1279_s22 = sadd.s32 4294967295, %s1547_s21   ;;  %s1280_s23 = sadd.s32 4294967294, %s1547_s21   ;;  %s1547_s21 = sphi %s1599_s21, %s22_s21   ;;  %s1543_s20 = sphi %s1597_s20, %s2217_s20   ;;  %s1539_s2 = sphi %s1595_s2, %s2216_s2   ;;  %s1535_s19 = sphi %s1593_s19, %s2215_s19   ;;  %s1531_s18 = sphi %s1591_s18, %s2214_s18   ;;  %s1527_s0 = sphi %s1589_s0, %s2213_s0  }
   0x7   : > { %s34_s24 = sadd.s32 1, %s1543_s20  ;;  %s143_s25 = sadd.s32 1, %s1535_s19 }
   0x8   : > { %p36_p0 = scmp.ge.s32.totalorder %s34_s24, 2  ;;  %p153_p1 = scmp.ne.s32.totalorder %s1535_s19, %s1531_s18 }
   0x9   : > { %p154_p2 = scmp.eq.s32.totalorder %s1279_s22, 1  ;;  %p159_p3 = scmp.ne.s32.totalorder %s1531_s18, %s1527_s0 }
   0xa   : > { %s2219_s24 = smov (%p36_p0, %s34_s24), 0  ;;  %p160_p5 = scmp.eq.s32.totalorder %s1280_s23, 1 }
   0xb   : > { %p1629_p4 = por %p154_p2, %p153_p1  ;;  %s138_s27 = ssub.s32 %s1543_s20, %s2219_s24 }
   0xc   : > { %p1283_p6 = scmp.ge.s32.totalorder %s1547_s21, 1  ;;  %p141_p7 = scmp.eq.s32.totalorder %s138_s27, 0 }
   0xd   : > { %p1636_p8 = por %p160_p5, %p159_p3  ;;  %p285_p9 = scmp.lt.s32.totalorder %s1547_s21, 3 }
   0xe   : > { %s1642_s29 = scalar_select %p141_p7, %s1535_s19, %s143_s25  }
   0xf   : > { %p286_p10 = pnand %p1283_p6, %p285_p9 }
  0x10   : > { %p372_p11 = scmp.lt.s32.totalorder (!%p286_p10), %s1539_s2, 1  ;;  %s1549_s10 = smov (!%p286_p10), 1  }
  0x11   : > { %289 = sbr.rel (%p286_p10) target bundleno = 394 (0x18a), region = 32  ;;  %s1550_s11 = smov (!%p286_p10), 127  }
  0x12   : > { %s1553_s12 = smov (!%p286_p10), 2   ;;  %s1727_s13 = sand.u32 (!%p286_p10), 1, %s1531_s18  }
  0x13   : > { %s1284_s14 = sshll.u32 (!%p286_p10), %s1727_s13, 5  ;;  %s1555_s16 = smov (!%p286_p10), 126  }
  0x14   : > { %s1770_s15 = scalar_lea.vmem (!%p286_p10), [#allocation4], %s1284_s14  ;;  %s1317_s27 = sshll.u32 (!%p286_p10), %s1539_s2, 5 }
  0x15   : > { %s1083_s7 = scalar_lea.hbm (!%p286_p10), %s2182_s4, %s1317_s27  ;;  %s1084_s8 = sshll.u32 (!%p286_p10), %s1770_s15, 4  ;;  %s1085_s8 = int_to_ptr.vmem [resolvable:$true] %s1084_s8 }
  0x16   : > { %s1646_s30 = scalar_select %p372_p11, %s1539_s2, 1  ;;  %v415_v4 = vlaneseq  ;;  %v1551_v8 = vmov -100.0   ;;  %v1552_v21 = vmov 0.0  }
  0x17   : > { %v560_v9 = vrot.slane %v1551_v8, 7  ;;  %v542_v17 = vrot.slane %v1551_v8, 1  ;;  %1390 = vrot.lane.b32.xlu2 %v1552_v21, %s1549_s10  ;;  %s1457_s22 = scalar_lea.hbm %s2182_s4, 64 }
  0x18   : > { %s1313_s6 = sshll.u32 %s1646_s30, 4  ;;  %v1676_v5 = vshrl.u32 %v415_v4, 7  ;;  %v1699_v28 = vand.u32 127, %v415_v4  ;;  %s1316_s17 = sshll.u32 %s1646_s30, 3 }
  0x19   : > { %s379_s9 = scalar_lea.vmem %s2179_s1, %s1313_s6  ;;  %s1849_s25 = scalar_lea.vmem %s2183_s5, %s1316_s17 }
  0x1a   : > { %v1652_v0 = vld [vmem:[%s379_s9] sm:$0xff]  ;;  %v1660_v2 = vld [vmem:[%s379_s9 + $0x8] sm:$0xff]  ;;  %v417_v7 = vadd.s32 8, %v1676_v5  ;;  %vm564_vm2 = vcmp.lt.s32.totalorder %v1676_v5, 1  ;;  %vm2184_vm3 = vcmp.lt.s32.totalorder %v1676_v5, 7  ;;  %v418_v16 = vadd.s32 16, %v1676_v5 }
  0x1b   : > { %vm442_vm0 = vcmp.ne.f32.partialorder %v1652_v0, 0.0  ;;  %vm443_vm1 = vcmp.ne.f32.partialorder %v1660_v2, 0.0  ;;  %vm470_vm8 = vcmp.gt.s32.totalorder %v1699_v28, 0  ;;  %vm453_vm9 = vcmp.lt.s32.totalorder %v1699_v28, 15  ;;  %s1086_s9 = sshll.u32 %s1083_s7, 4  ;;  %s1087_s9 = int_to_ptr.hbm [resolvable:$true] %s1086_s9 }
  0x1c   : > { %v1658_v1 = vsel %vm442_vm0, %v1652_v0, -100.0  ;;  %v1670_v3 = vsel %vm443_vm1, %v1660_v2, -100.0  ;;  %v426_v12 = vadd.s32 4294967288, %v417_v7  ;;  %v427_v22 = vadd.s32 4294967288, %v418_v16 }
  0x1d   : > { %473 = vrot.lane.b32.xlu1 %v1658_v1, %s1549_s10  ;;  %456 = vrot.lane.b32.xlu0 %v1658_v1, %s1550_s11  ;;  %v561_v6 = vrot.slane %v1658_v1, 7  ;;  %v540_v10 = vrot.slane %v1658_v1, 1  ;;  %v541_v11 = vrot.slane %v1670_v3, 1  ;;  %v562_v19 = vrot.slane %v1670_v3, 7 }
  0x1e   : > { %vm557_vm4 = vcmp.gt.s32.totalorder %v426_v12, 0  ;;  %vm537_vm5 = vcmp.lt.s32.totalorder %v427_v22, 15  ;;  %v1556_v0 = vmov 0  }
  0x1f   : > { %v567_v13 = vsel %vm564_vm2, %v560_v9, %v561_v6  ;;  %v545_v14 = vsel %vm2184_vm3, %v540_v10, %v541_v11  ;;  %v544_v23 = vsel %vm2184_vm3, %v541_v11, %v542_v17  ;;  %v566_v26 = vsel %vm564_vm2, %v561_v6, %v562_v19 }
  0x20   : > { %v570_v15 = vsub.f32 %v1658_v1, %v567_v13  ;;  %v549_v18 = vsub.f32 %v545_v14, %v1658_v1  ;;  %v550_v27 = vsub.f32 %v544_v23, %v1670_v3  ;;  %v571_v30 = vsub.f32 %v1670_v3, %v566_v26 }
  0x22   : > { %v574_v20 = vsel %vm557_vm4, %v570_v15, 0.0  ;;  %v578_v24 = vand.u32 2147483647, %v549_v18  ;;  %vm602_vm6 = vcmp.lt.f32.partialorder %v549_v18, 0.0  ;;  %v554_v31 = vsel %vm537_vm5, %v550_v27, 0.0 }
  0x23   : > { %v582_v25 = vand.u32 2147483647, %v574_v20  ;;  %vm606_vm7 = vcmp.lt.f32.partialorder %v574_v20, 0.0  ;;  %vm590_vm10 = vcmp.gt.f32.partialorder %v549_v18, 0.0  ;;  %vm594_vm11 = vcmp.gt.f32.partialorder %v574_v20, 0.0 }
  0x24   : > { %v583_v35 = vand.u32 2147483647, %v571_v30  ;;  %vm610_vm12 = vmand %vm602_vm6, %vm606_vm7  ;;  %v579_v38 = vand.u32 2147483647, %v554_v31  ;;  %vm603_vm14 = vcmp.lt.f32.partialorder %v554_v31, 0.0  ;;  %vm607_vm15 = vcmp.lt.f32.partialorder %v571_v30, 0.0 }
  0x25   : > { %475 = vrot.lane.b32.xlu1 %v1670_v3, %s1549_s10  ;;  %458 = vrot.lane.b32.xlu0 %v1670_v3, %s1550_s11  ;;  %v586_v29 = vmin.f32 %v578_v24, %v582_v25  ;;  %vm598_vm13 = vmand %vm590_vm10, %vm594_vm11 }
  0x26   : > { %v587_v44 = vmin.f32 %v579_v38, %v583_v35  ;;  %vm1720_vm3 = vmand %vm603_vm14, %vm607_vm15 }
  0x27   : > { %v614_v34 = vsub.f32 0.0, %v586_v29 }
  0x28   : > { %v615_v53 = vsub.f32 0.0, %v587_v44 }
  0x29   : > { %v618_v43 = vsel %vm610_vm12, %v614_v34, 0.0  ;;  %vm591_vm12 = vcmp.gt.f32.partialorder %v554_v31, 0.0 }
  0x2a   : > { %v1718_v46 = vsel %vm598_vm13, %v586_v29, %v618_v43  ;;  %vm595_vm13 = vcmp.gt.f32.partialorder %v571_v30, 0.0  ;;  %v619_v62 = vsel %vm1720_vm3, %v615_v53, 0.0  ;;  %vm1554_vm3 = vmmov 1  }
  0x2b   : > { %v706_v55 = vmul.f32 %v1718_v46, %v1718_v46  ;;  %vm599_vm14 = vmand %vm591_vm12, %vm595_vm13  ;;  %v634_v22 = vand.u32 2147483647, %v1718_v46 }
  0x2c   : > { %v1752_v6 = vsel %vm599_vm14, %v587_v44, %v619_v62  ;;  %vm1783_vm12 = vmxor %vm442_vm0, %vm1554_vm3 }
  0x2d   : > { %1395 = vrot.lane.b32.xlu1 %v1552_v21, %s1553_s12  ;;  %1405 = vrot.lane.b32.xlu0 %v1552_v21, %s1549_s10  ;;  %v707_v11 = vmul.f32 %v1752_v6, %v1752_v6  ;;  %vm1795_vm14 = vmxor %vm443_vm1, %vm1554_vm3 }
  0x35   : > { %1400 = vrot.lane.b32.xlu1 %v1552_v21, %s1550_s11 }
  0x3d   : > { %1410 = vrot.lane.b32.xlu1 %v1552_v21, %s1553_s12 }
  0x45   : > { %1415 = vrot.lane.b32.xlu1 %v1552_v21, %s1550_s11 }
  0x4d   : > { %1420 = vrot.lane.b32.xlu1 %v1552_v21, %s1555_s16 }
  0x8f   : > { %v474_v32 = vpop.permute.xlu1 %473  ;;  %v457_v33 = vpop.permute.xlu0 %456 }
  0x90   : > { %v480_v36 = vsub.f32 %v1658_v1, %v474_v32  ;;  %v463_v37 = vsub.f32 %v457_v33, %v1658_v1 }
  0x92   : > { %v484_v39 = vsel %vm470_vm8, %v480_v36, 0.0  ;;  %v467_v40 = vsel %vm453_vm9, %v463_v37, 0.0 }
  0x93   : > { %v492_v41 = vand.u32 2147483647, %v484_v39  ;;  %v488_v42 = vand.u32 2147483647, %v467_v40  ;;  %vm516_vm4 = vcmp.lt.f32.partialorder %v484_v39, 0.0  ;;  %vm512_vm5 = vcmp.lt.f32.partialorder %v467_v40, 0.0 }
  0x94   : > { %vm504_vm6 = vcmp.gt.f32.partialorder %v484_v39, 0.0  ;;  %vm500_vm7 = vcmp.gt.f32.partialorder %v467_v40, 0.0  ;;  %vm520_vm10 = vmand %vm512_vm5, %vm516_vm4 }
  0x95   : > { %v496_v45 = vmin.f32 %v488_v42, %v492_v41  ;;  %vm508_vm11 = vmand %vm500_vm7, %vm504_vm6 }
  0x97   : > { %v524_v47 = vsub.f32 0.0, %v496_v45  ;;  %v476_v48 = vpop.permute.xlu1 %475  ;;  %v459_v49 = vpop.permute.xlu0 %458 }
  0x98   : > { %v481_v51 = vsub.f32 %v1670_v3, %v476_v48  ;;  %v464_v52 = vsub.f32 %v459_v49, %v1670_v3 }
  0x99   : > { %v528_v54 = vsel %vm520_vm10, %v524_v47, 0.0 }
  0x9a   : > { %v1731_v56 = vsel %vm508_vm11, %v496_v45, %v528_v54  ;;  %v485_v57 = vsel %vm470_vm8, %v481_v51, 0.0  ;;  %v468_v58 = vsel %vm453_vm9, %v464_v52, 0.0  ;;  %v635_v54 = vand.u32 2147483647, %v1752_v6 }
  0x9b   : > { %v702_v59 = vmul.f32 %v1731_v56, %v1731_v56  ;;  %v493_v60 = vand.u32 2147483647, %v485_v57  ;;  %v489_v61 = vand.u32 2147483647, %v468_v58  ;;  %v626_v63 = vand.u32 2147483647, %v1731_v56 }
  0x9c   : > { %vm517_vm8 = vcmp.lt.f32.partialorder %v485_v57, 0.0  ;;  %vm513_vm9 = vcmp.lt.f32.partialorder %v468_v58, 0.0  ;;  %vm505_vm4 = vcmp.gt.f32.partialorder %v485_v57, 0.0  ;;  %vm501_vm5 = vcmp.gt.f32.partialorder %v468_v58, 0.0 }
  0x9d   : > { %v1745_v1 = vadd.f32 %v706_v55, %v702_v59  ;;  %v497_v3 = vmin.f32 %v489_v61, %v493_v60  ;;  %vm1747_vm15 = vcmp.gt.f32.partialorder %v626_v63, 10.0  ;;  %vm521_vm10 = vmand %vm513_vm9, %vm517_vm8 }
  0x9e   : > { %vm642_vm6 = vmxor %vm1747_vm15, %vm1554_vm3 }
  0x9f   : > { %1429 = vrsqrt.f32 %v1745_v1  ;;  %v525_v7 = vsub.f32 0.0, %v497_v3  ;;  %vm1759_vm7 = vmand %vm642_vm6, %vm442_vm0  ;;  %v735_v38 = vand.u32 2147483648, %v1745_v1 }
  0xa0   : > { %v657_v9 = vsel %vm1759_vm7, %v1731_v56, 0.0  ;;  %vm509_vm11 = vmand %vm501_vm5, %vm505_vm4  ;;  %vm1809_vm4 = vcmp.gt.f32.partialorder %v634_v22, 10.0 }
  0xa1   : > { %v529_v10 = vsel %vm521_vm10, %v525_v7, 0.0  ;;  %659 = vst [vmem:[%s1770_s15] sm:$0xff] %v657_v9  ;;  %vm650_vm6 = vmxor %vm1809_vm4, %vm1554_vm3 }
  0xa2   : > { %v1773_v12 = vsel %vm509_vm11, %v497_v3, %v529_v10  ;;  %vm1826_vm10 = vmand %vm650_vm6, %vm442_vm0  ;;  %vm732_vm0 = vcmp.eq.f32.partialorder %v1745_v1, inf }
  0xa3   : > { %v703_v13 = vmul.f32 %v1773_v12, %v1773_v12  ;;  %v627_v14 = vand.u32 2147483647, %v1773_v12  ;;  %vm668_vm11 = vmor %vm1747_vm15, %vm1783_vm12  ;;  %v661_v31 = vsel %vm1826_vm10, %v1718_v46, 0.0 }
  0xa4   : > { %1298 = vst [vmem:[%s1770_s15 + $0x10] sm:$0xff] %v661_v31 }
  0xa5   : > { %v1430_v15 = vpop.eup %1429  ;;  %v711_v17 = vadd.f32 %v707_v11, %v703_v13  ;;  %vm1788_vm13 = vcmp.gt.f32.partialorder %v627_v14, 10.0 }
  0xa6   : > { %v726_v18 = vmul.f32 %v1430_v15, %v1745_v1  ;;  %vm643_vm8 = vmxor %vm1788_vm13, %vm1554_vm3 }
  0xa7   : > { %1431 = vrsqrt.f32 %v711_v17  ;;  %vm1805_vm9 = vmand %vm643_vm8, %vm443_vm1  ;;  %vm734_vm8 = vcmp.eq.f32.partialorder %v1745_v1, 0.0  ;;  %v747_v57 = vand.u32 2147483648, %v711_v17  ;;  %vm746_vm6 = vcmp.eq.f32.partialorder %v711_v17, 0.0 }
  0xa8   : > { %v727_v23 = vmul.f32 %v1430_v15, %v726_v18  ;;  %v658_v26 = vsel %vm1805_vm9, %v1773_v12, 0.0  ;;  %vm669_vm5 = vmor %vm1788_vm13, %vm1795_vm14 }
  0xa9   : > { %660 = vst [vmem:[%s1770_s15 + $0x8] sm:$0xff] %v658_v26  ;;  %vm670_vm13 = vmpackc.low %vm669_vm5, %vm668_vm11  ;;  %vm744_vm5 = vcmp.eq.f32.partialorder %v711_v17, inf  ;;  %vm1854_vm11 = vcmp.gt.f32.partialorder %v635_v54, 10.0 }
  0xaa   : > { %v728_v27 = vmul.f32 0.5, %v727_v23  ;;  %v671_v34 = vsel %vm670_vm13, 16711935, %v1556_v0  ;;  %vm651_vm13 = vmxor %vm1854_vm11, %vm1554_vm3 }
  0xab   : > { %v673_v35 = vpack.c.b8 %v671_v34, %v671_v34  ;;  %vm685_vm3 = vmor %vm1854_vm11, %vm1795_vm14 }
  0xac   : > { %v729_v30 = vsub.f32 1.5, %v728_v27 }
  0xad   : > { %v1432_v32 = vpop.eup %1431  ;;  %vm674_vm15 = vnez %v673_v35 }
  0xae   : > { %v730_v33 = vmul.f32 %v1430_v15, %v729_v30  ;;  %v738_v36 = vmul.f32 %v1432_v32, %v711_v17  ;;  %v675_v41 = vsel %vm674_vm15, 16843009, %v1556_v0  ;;  %vm684_vm15 = vmor %vm1809_vm4, %vm1783_vm12 }
  0xaf   : > { %v676_v43 = vunpack.c.0.s8 %v675_v41  ;;  %v677_v44 = vunpack.c.1.s8 %v675_v41  ;;  %vm686_vm12 = vmpackc.low %vm685_vm3, %vm684_vm15 }
  0xb0   : > { %v731_v37 = vmul.f32 %v730_v33, %v1745_v1  ;;  %v739_v39 = vmul.f32 %v1432_v32, %v738_v36  ;;  %v687_v15 = vsel %vm686_vm12, 16711935, %v1556_v0 }
  0xb1   : > { %v678_v48 = vpack.c.b16 %v676_v43, %v676_v43  ;;  %v680_v49 = vpack.c.b16 %v677_v44, %v677_v44  ;;  %v689_v18 = vpack.c.b8 %v687_v15, %v687_v15 }
  0xb2   : > { %v733_v40 = vsel %vm732_vm0, %v1745_v1, %v731_v37  ;;  %v740_v45 = vmul.f32 0.5, %v739_v39 }
  0xb3   : > { %v736_v42 = vsel %vm734_vm8, %v735_v38, %v733_v40  ;;  %v679_v51 = vpack.c.b8 %v678_v48, %v678_v48  ;;  %v681_v52 = vpack.c.b8 %v680_v49, %v680_v49  ;;  %vm690_vm4 = vnez %v689_v18 }
  0xb4   : > { %v762_v47 = vadd.f32 1e-06, %v736_v42  ;;  %v741_v50 = vsub.f32 1.5, %v740_v45  ;;  %v691_v30 = vsel %vm690_vm4, 16843009, %v1556_v0 }
  0xb5   : > { %682 = vst [vmem:[%s1849_s25] sm:$0x3] %v679_v51  ;;  %v693_v8 = vunpack.c.1.s8 %v691_v30 }
  0xb6   : > { %1433 = vrcp.f32 %v762_v47  ;;  %v742_v53 = vmul.f32 %v1432_v32, %v741_v50  ;;  %683 = vst [vmem:[%s1849_s25 + $0x2] sm:$0x3] %v681_v52  ;;  %v790_v3 = vand.u32 2147483648, %v762_v47  ;;  %vm784_vm8 = vweird.f32 %v762_v47 }
  0xb7   : > { %v788_v7 = vand.u32 2147483647, %v762_v47  ;;  %v696_v32 = vpack.c.b16 %v693_v8, %v693_v8 }
  0xb8   : > { %v743_v55 = vmul.f32 %v742_v53, %v711_v17  ;;  %v791_v13 = vor.u32 1.1754944e-38, %v790_v3 }
  0xb9   : > { %v697_v35 = vpack.c.b8 %v696_v32, %v696_v32 }
  0xba   : > { %v745_v58 = vsel %vm744_vm5, %v711_v17, %v743_v55  ;;  %vm1867_vm5 = vmand %vm651_vm13, %vm443_vm1  ;;  %vm789_vm1 = vcmp.eq.f32.partialorder %v788_v7, 8.507059e+37 }
  0xbb   : > { %v748_v61 = vsel %vm746_vm6, %v747_v57, %v745_v58  ;;  %v662_v11 = vsel %vm1867_vm5, %v1752_v6, 0.0  ;;  %1301 = vst [vmem:[%s1849_s25 + $0x6] sm:$0x3] %v697_v35 }
  0xbc   : > { %v1434_v60 = vpop.eup %1433  ;;  %v763_v63 = vadd.f32 1e-06, %v748_v61  ;;  %1299 = vst [vmem:[%s1770_s15 + $0x18] sm:$0xff] %v662_v11 }
  0xbd   : > { %v780_v62 = vmul.f32 %v1434_v60, %v762_v47  ;;  %vm785_vm0 = vweird.f32 %v1434_v60 }
  0xbe   : > { %1435 = vrcp.f32 %v763_v63  ;;  %vm786_vm6 = vmor %vm784_vm8, %vm785_vm0  ;;  %v802_v20 = vand.u32 2147483647, %v763_v63  ;;  %v804_v27 = vand.u32 2147483648, %v763_v63 }
  0xbf   : > { %v781_v1 = vsub.f32 1.0, %v780_v62 }
  0xc0   : > { %v805_v33 = vor.u32 1.1754944e-38, %v804_v27  ;;  %vm803_vm11 = vcmp.eq.f32.partialorder %v802_v20, 8.507059e+37 }
  0xc1   : > { %v782_v4 = vmul.f32 %v1434_v60, %v781_v1 }
  0xc3   : > { %v783_v10 = vadd.f32 %v1434_v60, %v782_v4 }
  0xc4   : > { %v1436_v14 = vpop.eup %1435 }
  0xc5   : > { %v787_v2 = vsel %vm786_vm6, %v1434_v60, %v783_v10  ;;  %v794_v17 = vmul.f32 %v1436_v14, %v763_v63  ;;  %vm799_vm14 = vweird.f32 %v1436_v14 }
  0xc6   : > { %v792_v16 = vsel %vm789_vm1, %v791_v13, %v787_v2 }
  0xc7   : > { %v822_v19 = vmul.f32 %v792_v16, %v1731_v56  ;;  %v830_v22 = vmul.f32 %v792_v16, %v1718_v46  ;;  %v795_v23 = vsub.f32 1.0, %v794_v17  ;;  %v692_v56 = vunpack.c.0.s8 %v691_v30 }
  0xc9   : > { %v1884_v25 = vsel %vm1759_vm7, %v822_v19, 0.0  ;;  %v1888_v26 = vsel %vm1826_vm10, %v830_v22, 0.0  ;;  %v796_v46 = vmul.f32 %v1436_v14, %v795_v23  ;;  %vm798_vm7 = vweird.f32 %v763_v63 }
  0xca   : > { %840 = vrot.lane.b32.xlu2 %v1884_v25, %s1549_s10  ;;  %941 = vrot.lane.b32.xlu1 %v1888_v26, %s1549_s10  ;;  %v694_v29 = vpack.c.b16 %v692_v56, %v692_v56  ;;  %vm800_vm10 = vmor %vm798_vm7, %vm799_vm14 }
  0xcb   : > { %v797_v31 = vadd.f32 %v1436_v14, %v796_v46 }
  0xcc   : > { %v695_v0 = vpack.c.b8 %v694_v29, %v694_v29 }
  0xcd   : > { %v801_v34 = vsel %vm800_vm10, %v1436_v14, %v797_v31 }
  0xce   : > { %v806_v36 = vsel %vm803_vm11, %v805_v33, %v801_v34  ;;  %1300 = vst [vmem:[%s1849_s25 + $0x4] sm:$0x3] %v695_v0 }
  0xcf   : > { %v823_v37 = vmul.f32 %v806_v36, %v1773_v12  ;;  %v831_v12 = vmul.f32 %v806_v36, %v1752_v6 }
  0xd1   : > { %v1900_v38 = vsel %vm1805_vm9, %v823_v37, 0.0  ;;  %v1915_v24 = vsel %vm1867_vm5, %v831_v12, 0.0 }
  0xd2   : > { %857 = vrot.lane.b32.xlu2 %v1884_v25, %s1553_s12  ;;  %989 = vrot.lane.b32.xlu1 %v1888_v26, %s1555_s16 }
  0xd3   : > { %842 = vrot.lane.b32.xlu0 %v1900_v38, %s1549_s10 }
  0xda   : > { %874 = vrot.lane.b32.xlu2 %v1884_v25, %s1550_s11 }
  0xdb   : > { %859 = vrot.lane.b32.xlu0 %v1900_v38, %s1553_s12 }
  0xe2   : > { %943 = vrot.lane.b32.xlu2 %v1915_v24, %s1549_s10  ;;  %s1042_s10 = scalar_lea.sflag [#allocation5], %s1727_s13 }
  0xe3   : > { %876 = vrot.lane.b32.xlu0 %v1900_v38, %s1550_s11 }
  0xea   : > { %957 = vrot.lane.b32.xlu2 %v1888_v26, %s1553_s12 }
  0xeb   : > { %959 = vrot.lane.b32.xlu0 %v1915_v24, %s1553_s12 }
  0xf2   : > { %973 = vrot.lane.b32.xlu2 %v1888_v26, %s1550_s11 }
  0xf3   : > { %975 = vrot.lane.b32.xlu0 %v1915_v24, %s1550_s11  ;;  %s1451_s11 = sshra.s32 %s1087_s9, 4  ;;  %s1452_s11 = int_to_ptr.hbm [resolvable:$true] %s1451_s11 }
  0xf4   : > { %s1453_s12 = scalar_lea.hbm %s1452_s11, 32  ;;  %p1458_p1 = scmp.lt.s32.totalorder %s1452_s11, %s2182_s4 }
  0xf5   : > { %p1454_p12 = scmp.ne.s32.totalorder %s1452_s11, %s1453_s12  ;;  %p1459_p2 = scmp.lt.s32.totalorder %s1457_s22, %s1453_s12 }
  0xf7   : > { %p1455_p13 = pnand %p1454_p12, %p1629_p4  ;;  %p1460_p3 = por %p1459_p2, %p1458_p1 }
  0xf9   : > { %p1456_p0 = pneg %p1455_p13 }
  0xfa   : > { %891 = vrot.lane.b32.xlu2 %v1884_v25, %s1555_s16 }
  0xfb   : > { %893 = vrot.lane.b32.xlu0 %v1900_v38, %s1555_s16  ;;  %p1461_p5 = pnand %p1460_p3, %p1456_p0 }
 0x102   : > { %991 = vrot.lane.b32.xlu2 %v1915_v24, %s1555_s16 }
 0x103   : > { %1425 = vrot.lane.b32.xlu0 %v1552_v21, %s1555_s16 }
 0x104   : > { %1464 = shalt.err (!%p1461_p5)
}
 0x105   : > { %s1557_s15 = smov 128   ;;  %s1558_s30 = smov 8   ;;  %v1958_v21 = vpop.permute.xlu2 %1390  ;;  %v1960_v6 = vpop.permute.xlu1 %1395  ;;  %vm837_vm9 = vcmp.ge.s32.totalorder %v1699_v28, 1  ;;  %vm854_vm13 = vcmp.ge.s32.totalorder %v1699_v28, 2  ;;  %vm871_vm0 = vcmp.lt.s32.totalorder %v1699_v28, 127  ;;  %vm888_vm15 = vcmp.lt.s32.totalorder %v1699_v28, 126 }
 0x106   : > { %1320 = dma.vmem_to_hbm [thread:$0]  (%p1629_p4), %s1085_s8, 512, %s1087_s9, %s1042_s10, %s1557_s15, %s1557_s15, %s1558_s30   ;;  %v1966_v44 = vpop.permute.xlu0 %1405  ;;  %v1397_v59 = vunpack.i.l.bf16 %v1960_v6  ;;  %v1392_v60 = vunpack.i.l.bf16 %v1958_v21  ;;  %v1393_v35 = vunpack.i.h.bf16 %v1958_v21  ;;  %vm922_vm8 = vcmp.lt.s32.totalorder %v1676_v5, 2 }
 0x107   : > { %v1407_v55 = vunpack.i.l.bf16 %v1966_v44  ;;  %vm2209_vm5 = vcmp.lt.s32.totalorder %v1676_v5, 7  ;;  %vm930_vm6 = vcmp.lt.s32.totalorder %v1676_v5, 6  ;;  %s2098_s6 = scalar_lea.vmem [#allocation2], %s1284_s14  ;;  %s1064_s8 = scalar_lea.hbm %s2181_s3, %s1317_s27 }
 0x108   : > { %v863_v11 = vsel %vm854_vm13, %v1397_v59, 0.0  ;;  %v846_v13 = vsel %vm837_vm9, %v1392_v60, 0.0  ;;  %v849_v59 = vsel %vm837_vm9, %v1393_v35, 0.0  ;;  %vm2210_vm3 = vmmov %vm2209_vm5  ;;  %s1065_s9 = sshll.u32 %s2098_s6, 4  ;;  %s1067_s2 = sshll.u32 %s1064_s8, 4  ;;  %s1066_s9 = int_to_ptr.vmem [resolvable:$true] %s1065_s9  ;;  %s1068_s2 = int_to_ptr.hbm [resolvable:$true] %s1067_s2 }
 0x109   : > { %v947_v63 = vsel %vm837_vm9, %v1407_v55, 0.0  ;;  %v867_v22 = vadd.f32 %v863_v11, %v846_v13  ;;  %vm2211_vm12 = vmmov %vm2210_vm3  ;;  %s1037_s27 = scalar_lea.sflag [#allocation3], %s1727_s13  ;;  %s1479_s10 = sshra.s32 %s1068_s2, 4  ;;  %s1480_s10 = int_to_ptr.hbm [resolvable:$true] %s1479_s10 }
 0x10a   : > { %s1481_s11 = scalar_lea.hbm %s1480_s10, 32  ;;  %s1485_s16 = scalar_lea.hbm %s2181_s3, 64 }
 0x10b   : > { %p1482_p6 = scmp.ne.s32.totalorder %s1480_s10, %s1481_s11  ;;  %p1486_p10 = scmp.lt.s32.totalorder %s1480_s10, %s2181_s3 }
 0x10c   : > { %p1487_p11 = scmp.lt.s32.totalorder %s1485_s16, %s1481_s11 }
 0x10d   : > { %v1962_v40 = vpop.permute.xlu1 %1400  ;;  %p1483_p7 = pnand %p1482_p6, %p1629_p4 }
 0x10e   : > { %v1402_v15 = vunpack.i.l.bf16 %v1962_v40  ;;  %p1488_p12 = por %p1487_p11, %p1486_p10 }
 0x10f   : > { %p1484_p9 = pneg %p1483_p7 }
 0x110   : > { %v880_v56 = vsel %vm871_vm0, %v1402_v15, 0.0 }
 0x111   : > { %v884_v36 = vadd.f32 %v880_v56, %v867_v22  ;;  %p1489_p13 = pnand %p1488_p12, %p1484_p9 }
 0x115   : > { %v1964_v43 = vpop.permute.xlu1 %1410 }
 0x116   : > { %v1412_v54 = vunpack.i.l.bf16 %v1964_v43 }
 0x118   : > { %v963_v61 = vsel %vm854_vm13, %v1412_v54, 0.0 }
 0x119   : > { %v967_v7 = vadd.f32 %v963_v61, %v947_v63  ;;  %v1413_v61 = vunpack.i.h.bf16 %v1964_v43 }
 0x11d   : > { %v1968_v47 = vpop.permute.xlu1 %1415 }
 0x11e   : > { %v1417_v62 = vunpack.i.l.bf16 %v1968_v47  ;;  %v1418_v22 = vunpack.i.h.bf16 %v1968_v47 }
 0x120   : > { %v979_v14 = vsel %vm871_vm0, %v1417_v62, 0.0  ;;  %v982_v35 = vsel %vm871_vm0, %v1418_v22, 0.0 }
 0x121   : > { %v983_v20 = vadd.f32 %v979_v14, %v967_v7 }
 0x124   : > { %v841_v39 = vpop.permute.xlu2 %840 }
 0x125   : > { %v1421_v50 = vpop.permute.xlu1 %1420  ;;  %v847_v19 = vsel %vm837_vm9, %v841_v39, 0.0 }
 0x126   : > { %v1423_v2 = vunpack.i.h.bf16 %v1421_v50  ;;  %v1422_v23 = vunpack.i.l.bf16 %v1421_v50  ;;  %v851_v8 = vadd.f32 %v847_v19, %v1884_v25 }
 0x128   : > { %v995_v27 = vsel %vm888_vm15, %v1423_v2, 0.0  ;;  %v897_v37 = vsel %vm888_vm15, %v1422_v23, 0.0  ;;  %v1403_v2 = vunpack.i.h.bf16 %v1962_v40  ;;  %v966_v40 = vsel %vm854_vm13, %v1413_v61, 0.0 }
 0x129   : > { %v999_v34 = vadd.f32 %v995_v27, %v983_v20  ;;  %v901_v55 = vadd.f32 %v897_v37, %v884_v36 }
 0x12b   : > { %v1003_v50 = vrot.slane %v999_v34, 7  ;;  %v905_v7 = vrot.slane %v901_v55, 7  ;;  %v1017_v43 = vrot.slane %v999_v34, 6 }
 0x12c   : > { %v858_v41 = vpop.permute.xlu2 %857 }
 0x134   : > { %v875_v42 = vpop.permute.xlu2 %874 }
 0x135   : > { %v881_v29 = vsel %vm871_vm0, %v875_v42, 0.0 }
 0x13c   : > { %v944_v45 = vpop.permute.xlu2 %943  ;;  %v942_v53 = vpop.permute.xlu1 %941 }
 0x13d   : > { %v948_v58 = vsel %vm837_vm9, %v942_v53, 0.0  ;;  %v949_v30 = vsel %vm837_vm9, %v944_v45, 0.0 }
 0x13e   : > { %v952_v3 = vadd.f32 %v948_v58, %v1888_v26  ;;  %v864_v26 = vsel %vm854_vm13, %v858_v41, 0.0  ;;  %v953_v0 = vadd.f32 %v949_v30, %v1915_v24  ;;  %v1398_v24 = vunpack.i.h.bf16 %v1960_v6 }
 0x13f   : > { %v868_v33 = vadd.f32 %v864_v26, %v851_v8 }
 0x141   : > { %v885_v12 = vadd.f32 %v881_v29, %v868_v33 }
 0x144   : > { %v958_v49 = vpop.permute.xlu2 %957  ;;  %v990_v16 = vpop.permute.xlu1 %989 }
 0x145   : > { %v843_v48 = vpop.permute.xlu0 %842  ;;  %v964_v1 = vsel %vm854_vm13, %v958_v49, 0.0  ;;  %v996_v46 = vsel %vm888_vm15, %v990_v16, 0.0 }
 0x146   : > { %v968_v9 = vadd.f32 %v964_v1, %v952_v3  ;;  %v848_v39 = vsel %vm837_vm9, %v843_v48, 0.0 }
 0x147   : > { %v852_v48 = vadd.f32 %v848_v39, %v1900_v38 }
 0x14c   : > { %v974_v52 = vpop.permute.xlu2 %973 }
 0x14d   : > { %v860_v51 = vpop.permute.xlu0 %859  ;;  %v980_v4 = vsel %vm871_vm0, %v974_v52, 0.0 }
 0x14e   : > { %v984_v17 = vadd.f32 %v980_v4, %v968_v9  ;;  %v865_v52 = vsel %vm854_vm13, %v860_v51, 0.0  ;;  %v866_v51 = vsel %vm854_vm13, %v1398_v24, 0.0  ;;  %v1408_v9 = vunpack.i.h.bf16 %v1966_v44 }
 0x14f   : > { %v869_v62 = vadd.f32 %v865_v52, %v852_v48  ;;  %v870_v56 = vadd.f32 %v866_v51, %v849_v59 }
 0x150   : > { %v2012_v31 = vadd.f32 %v996_v46, %v984_v17  ;;  %v950_v23 = vsel %vm837_vm9, %v1408_v9, 0.0 }
 0x151   : > { %v970_v47 = vadd.f32 %v966_v40, %v950_v23 }
 0x152   : > { %v1004_v41 = vrot.slane %v2012_v31, 7  ;;  %v1010_v63 = vrot.slane %v2012_v31, 1  ;;  %v1018_v1 = vrot.slane %v2012_v31, 6  ;;  %v1024_v16 = vrot.slane %v2012_v31, 2 }
 0x153   : > { %v986_v52 = vadd.f32 %v982_v35, %v970_v47 }
 0x154   : > { %v892_v10 = vpop.permute.xlu2 %891  ;;  %v1007_v6 = vsel %vm564_vm2, %v1003_v50, %v1004_v41  ;;  %v1021_v19 = vsel %vm922_vm8, %v1017_v43, %v1018_v1 }
 0x155   : > { %v1973_v57 = vpop.permute.xlu0 %876  ;;  %v898_v25 = vsel %vm888_vm15, %v892_v10, 0.0  ;;  %v1008_v10 = vadd.f32 %v1007_v6, %v2012_v31 }
 0x156   : > { %v2032_v53 = vadd.f32 %v898_v25, %v885_v12  ;;  %v882_v38 = vsel %vm871_vm0, %v1973_v57, 0.0 }
 0x157   : > { %v886_v11 = vadd.f32 %v882_v38, %v869_v62 }
 0x158   : > { %v906_v3 = vrot.slane %v2032_v53, 7  ;;  %v912_v26 = vrot.slane %v2032_v53, 1  ;;  %v920_v27 = vrot.slane %v2032_v53, 6  ;;  %v927_v25 = vrot.slane %v2032_v53, 2 }
 0x15a   : > { %v909_v17 = vsel %vm564_vm2, %v905_v7, %v906_v3 }
 0x15b   : > { %v910_v8 = vadd.f32 %v909_v17, %v2032_v53 }
 0x15c   : > { %v992_v45 = vpop.permute.xlu2 %991 }
 0x15d   : > { %v960_v18 = vpop.permute.xlu0 %959  ;;  %v997_v58 = vsel %vm888_vm15, %v992_v45, 0.0 }
 0x15e   : > { %v965_v32 = vsel %vm854_vm13, %v960_v18, 0.0 }
 0x15f   : > { %v969_v42 = vadd.f32 %v965_v32, %v953_v0  ;;  %v919_v32 = vrot.slane %v901_v55, 6  ;;  %v883_v0 = vsel %vm871_vm0, %v1403_v2, 0.0 }
 0x160   : > { %v887_v50 = vadd.f32 %v883_v0, %v870_v56 }
 0x161   : > { %v924_v45 = vsel %vm922_vm8, %v919_v32, %v920_v27 }
 0x165   : > { %v976_v49 = vpop.permute.xlu0 %975 }
 0x166   : > { %v981_v21 = vsel %vm871_vm0, %v976_v49, 0.0 }
 0x167   : > { %v985_v54 = vadd.f32 %v981_v21, %v969_v42 }
 0x169   : > { %v2043_v60 = vadd.f32 %v997_v58, %v985_v54 }
 0x16b   : > { %v1011_v4 = vrot.slane %v2043_v60, 1  ;;  %v1025_v14 = vrot.slane %v2043_v60, 2  ;;  %v1005_v12 = vrot.slane %v2043_v60, 7  ;;  %v1019_v62 = vrot.slane %v2043_v60, 6 }
 0x16d   : > { %v894_v13 = vpop.permute.xlu0 %893  ;;  %v1014_v57 = vsel %vm2209_vm5, %v1010_v63, %v1011_v4  ;;  %v1028_v46 = vsel %vm930_vm6, %v1024_v16, %v1025_v14  ;;  %v1006_v51 = vsel %vm564_vm2, %v1004_v41, %v1005_v12  ;;  %v1020_v2 = vsel %vm922_vm8, %v1018_v1, %v1019_v62 }
 0x16e   : > { %v899_v15 = vsel %vm888_vm15, %v894_v13, 0.0  ;;  %v1015_v44 = vadd.f32 %v1014_v57, %v1008_v10  ;;  %v1009_v9 = vadd.f32 %v1006_v51, %v2043_v60 }
 0x16f   : > { %v903_v18 = vadd.f32 %v899_v15, %v886_v11 }
 0x170   : > { %v1022_v20 = vadd.f32 %v1021_v19, %v1015_v44 }
 0x171   : > { %v913_v30 = vrot.slane %v903_v18, 1  ;;  %v928_v34 = vrot.slane %v903_v18, 2  ;;  %v907_v39 = vrot.slane %v903_v18, 7  ;;  %v921_v38 = vrot.slane %v903_v18, 6 }
 0x172   : > { %v1029_v29 = vadd.f32 %v1028_v46, %v1022_v20 }
 0x173   : > { %v916_v33 = vsel %vm2210_vm3, %v912_v26, %v913_v30  ;;  %v932_v53 = vsel %vm930_vm6, %v927_v25, %v928_v34  ;;  %v908_v6 = vsel %vm564_vm2, %v906_v3, %v907_v39  ;;  %vm2212_vm2 = vmmov %vm2210_vm3  ;;  %v923_v57 = vsel %vm922_vm8, %v920_v27, %v921_v38 }
 0x174   : > { %v917_v36 = vadd.f32 %v916_v33, %v910_v8  ;;  %v1031_v37 = vmul.f32 0.04, %v1029_v29  ;;  %v911_v28 = vadd.f32 %v908_v6, %v903_v18 }
 0x175   : > { %v1426_v42 = vpop.permute.xlu0 %1425 }
 0x176   : > { %v1428_v49 = vunpack.i.h.bf16 %v1426_v42  ;;  %v1427_v24 = vunpack.i.l.bf16 %v1426_v42  ;;  %v925_v21 = vadd.f32 %v924_v45, %v917_v36  ;;  %1302 = vst [vmem:[%s2098_s6 + $0x10] sm:$0xff] %v1031_v37 }
 0x178   : > { %v998_v54 = vsel %vm888_vm15, %v1428_v49, 0.0  ;;  %v900_v55 = vsel %vm888_vm15, %v1427_v24, 0.0  ;;  %v933_v48 = vadd.f32 %v932_v53, %v925_v21 }
 0x179   : > { %v1002_v58 = vadd.f32 %v998_v54, %v986_v52  ;;  %v904_v59 = vadd.f32 %v900_v55, %v887_v50 }
 0x17a   : > { %v935_v61 = vmul.f32 0.04, %v933_v48 }
 0x17b   : > { %v1012_v63 = vrot.slane %v1002_v58, 1  ;;  %v914_v7 = vrot.slane %v904_v59, 1  ;;  %v1026_v10 = vrot.slane %v1002_v58, 2  ;;  %v929_v43 = vrot.slane %v904_v59, 2 }
 0x17c   : > { %937 = vst [vmem:[%s2098_s6] sm:$0xff] %v935_v61 }
 0x17d   : > { %v915_v3 = vsel %vm2211_vm12, %v913_v30, %v914_v7  ;;  %v1013_v41 = vsel %vm2212_vm2, %v1011_v4, %v1012_v63  ;;  %v931_v44 = vsel %vm930_vm6, %v928_v34, %v929_v43  ;;  %v1027_v31 = vsel %vm930_vm6, %v1025_v14, %v1026_v10 }
 0x17e   : > { %v918_v11 = vadd.f32 %v915_v3, %v911_v28  ;;  %v1016_v13 = vadd.f32 %v1013_v41, %v1009_v9 }
 0x180   : > { %v926_v15 = vadd.f32 %v923_v57, %v918_v11  ;;  %v1023_v4 = vadd.f32 %v1020_v2, %v1016_v13 }
 0x182   : > { %v934_v16 = vadd.f32 %v931_v44, %v926_v15  ;;  %v1030_v17 = vadd.f32 %v1027_v31, %v1023_v4 }
 0x184   : > { %v936_v1 = vmul.f32 0.04, %v934_v16  ;;  %v1032_v18 = vmul.f32 0.04, %v1030_v17 }
 0x186   : > { %938 = vst [vmem:[%s2098_s6 + $0x8] sm:$0xff] %v936_v1 }
 0x187   : > { %1303 = vst [vmem:[%s2098_s6 + $0x18] sm:$0xff] %v1032_v18 }
 0x188   : > { %1492 = shalt.err (!%p1489_p13)
}
 0x189   : > { %1319 = dma.vmem_to_hbm [thread:$0]  (%p1629_p4), %s1066_s9, 512, %s1068_s2, %s1037_s27, %s1557_s15, %s1557_s15, %s1558_s30  }
 0x18a PF: > { %p1330_p0 = scmp.ge.s32.totalorder %s1547_s21, 2  ;;  %s1105_s13 = sand.u32 1, %s1527_s0  }
 0x18b   : > { %s1106_s25 = scalar_lea.sflag [#allocation3], %s1105_s13 }
 0x18c   : > { %p1324_p1 = pnand %p1330_p0, %p1636_p8 }
 0x18e   : > { %p1325_p2 = pneg %p1324_p1 }
 0x190   : > { %1518 = dma.done.wait (%p1325_p2), %s1106_s25, 512  }
 0x191   : > { %1520 = vsyncadd (%p1325_p2), %s1106_s25, 4294966784  ;;  %s1116_s6 = scalar_lea.sflag [#allocation5], %s1105_s13 }
 0x192   : > { %1522 = dma.done.wait (%p1325_p2), %s1116_s6, 512  }
 0x193   : > { %1524 = vsyncadd (%p1325_p2), %s1116_s6, 4294966784  ;;  %s22_s21 = sadd.s32 1, %s1547_s21   ;;  %s2213_s0 = smov %s1531_s18 }
 0x194   : > { %p19_p3 = scmp.ge.s32.totalorder %s22_s21, 4   ;;  %s2214_s18 = smov %s1535_s19 }
 0x195   : > { %s2215_s19 = smov %s1642_s29  ;;  %s2216_s2 = smov %s1543_s20 }
 0x196   : > { %s2217_s20 = smov %s2219_s24  ;;  %21 = sbr.rel (!%p19_p3) target bundleno = 6 (0x6), region = 105 }
 0x19b   :  { %1134 = vsyncpa [#allocation3], 1 }
 0x19c   :  { %1136 = vsyncpa [#allocation3 + $0x1], 1 }
 0x19d   :  { %1137 = vsyncpa [#allocation5], 1 }
 0x19e   :  { %1139 = vsyncpa [#allocation5 + $0x1], 1 }

</bundles_post_ra>
